<compile_context>
chip_gen: v5e
topology: v5e:2x2
jax: 0.10.0
libtpu: 0.0.40
codegen_flags: <defaults>
</compile_context>

<pallas_src>
import functools

import numpy as np
import jax
import jax.numpy as jnp
from jax.experimental import pallas as pl
from jax.experimental.pallas import tpu as pltpu

EPS = 0.0001


def gcn_kernel(x_ref, a_ref, wall_ref, ball_ref, wg1_ref, out_ref,
               *, layer_nums, hidden):
    """All `layer_nums` GCN layers in one kernel invocation (everything in VMEM)."""
    f32 = jnp.float32
    H = hidden

    X = x_ref[...]          # (N, H)   stacked [slot rows ; dialogue rows] (row-padded)
    A = a_ref[...]          # (N, 4N)  [A_rel1 | A_rel2 | A_rel3 | A_rel4] (normalized)
    W_all = wall_ref[...]   # (H, 6H)  [Ws | Wg2 | Wr0 | Wr1 | Wr2 | Wr3]
    b_all = ball_ref[...]   # (1, 6H)  [bs | bg  | br0 | br1 | br2 | br3]
    Wg1 = wg1_ref[...]      # (H, H)   f_g weight, x_r half

    # Static unroll of the layer loop keeps a single launch with weights / the
    # aggregation operator resident in VMEM; layer_nums is a compile-time const.
    for _ in range(layer_nums):
        # One lane-dense matmul = f_s + gate(x-half) + all 4 relation linears.
        Y = jnp.dot(X, W_all, preferred_element_type=f32) + b_all        # (N, 6H)
        base = Y[:, :H]                                                  # f_s(x)+bs
        gx = Y[:, H:2 * H]                                               # x@Wg2+bg
        # Sublane-stack the 4 relation outputs -> (4N, H): the entire masked /
        # normalized aggregation then collapses into one matmul with A (N, 4N).
        V = jnp.concatenate([Y[:, (2 + r) * H:(3 + r) * H] for r in range(4)],
                            axis=0)                                      # (4N, H)
        Xr = base + jnp.dot(A, V, preferred_element_type=f32)            # (N, H)

        # f_g(cat([x_r, x], -1)) == x_r @ Wg1 + x @ Wg2 + bg   (no sigmoid in ref)
        G = jnp.dot(Xr, Wg1, preferred_element_type=f32) + gx            # (N, H)

        X = jnp.maximum(Xr, 0.0) * G + X * (1.0 - G)

    out_ref[...] = X.astype(out_ref.dtype)


def multi_relational_gcn(slot, dia, m1, m2, m3, m4, params, layer_nums):
    """Wrapper: layer-invariant preprocessing in plain JAX, then one pallas_call."""
    Ws, bs, Wr, br, Wg1, Wg2, bg = params
    B, S, H = slot.shape
    D = dia.shape[0]
    NS = B * S
    N = NS + D
    Np = ((N + 7) // 8) * 8          # sublane-align the node dim (no-op when N%8==0)
    f32 = jnp.float32

    # ---- layer-invariant mask normalization (hoisted out of the kernel) -----
    m1n = m1 / (jnp.sum(m1, axis=-1, keepdims=True) + EPS)   # (B,S,D)
    m2n = m2 / (jnp.sum(m2, axis=-1, keepdims=True) + EPS)   # (B,S,S)
    m3n = m3 / (jnp.sum(m3, axis=-1, keepdims=True) + EPS)   # (B,S,D)
    m4n = m4 / (jnp.sum(m4, axis=-1, keepdims=True) + EPS)   # (B,S,S)

    def transposed_norm(m):                                   # (B,S,D) -> (D, B*S)
        # dialogue <- slot path: divide by per-(b,d) counts, flatten (b,s);
        # the cross-batch sum of the reference is absorbed by the single matmul.
        den = jnp.sum(m, axis=1) + EPS                        # (B, D)
        mt = jnp.transpose(m, (2, 0, 1)) / jnp.transpose(den)[:, :, None]  # (D,B,S)
        return mt.reshape(D, NS)

    M1T = transposed_norm(m1)
    M3T = transposed_norm(m3)

    # per-relation normalized adjacency over the stacked node set (N = B*S + D),
    # embedded in a sublane-aligned (Np, Np) block (padded rows/cols stay zero).
    def adj_slot_dia(mn, MT):             # relations 1 / 3
        A = jnp.zeros((Np, Np), f32)
        A = A.at[:NS, NS:N].set(mn.reshape(NS, D))   # slot <- dialogue
        A = A.at[NS:N, :NS].set(MT)                  # dialogue <- slot (summed over b)
        return A

    def adj_slot_slot(mn):                # relations 2 / 4 (block-diag per batch)
        A = jnp.zeros((Np, Np), f32)
        for b in range(B):
            A = A.at[b * S:(b + 1) * S, b * S:(b + 1) * S].set(mn[b])
        return A

    A_all = jnp.concatenate(
        [adj_slot_dia(m1n, M1T), adj_slot_slot(m2n),
         adj_slot_dia(m3n, M3T), adj_slot_slot(m4n)], axis=1)            # (Np, 4Np)

    # fused weight slab: f_s + gate(x-half) + the 4 relation linears (all (in,out))
    W_all = jnp.concatenate([Ws, Wg2, Wr[0], Wr[1], Wr[2], Wr[3]], axis=1)  # (H, 6H)
    b_all = jnp.concatenate(
        [bs.reshape(1, H), bg.reshape(1, H)]
        + [br[i].reshape(1, H) for i in range(4)], axis=1)               # (1, 6H)

    X0 = jnp.zeros((Np, H), slot.dtype)
    X0 = X0.at[:NS].set(slot.reshape(NS, H)).at[NS:N].set(dia)           # (Np, H)

    vmem = pl.BlockSpec(memory_space=pltpu.MemorySpace.VMEM)
    kernel = functools.partial(gcn_kernel, layer_nums=layer_nums, hidden=H)
    X_out = pl.pallas_call(
        kernel,
        out_shape=jax.ShapeDtypeStruct((Np, H), slot.dtype),
        in_specs=[vmem] * 5,
        out_specs=vmem,
    )(X0, A_all, W_all, b_all, Wg1)

    return X_out[:NS].reshape(B, S, H), X_out[NS:N]


def reference_layer(slot, dia, m1, m2, m3, m4, params):
    """Pure-JAX reference mirroring the PyTorch forward (one layer)."""
    Ws, bs, Wr, br, Wg1, Wg2, bg = params
    dia_r = dia @ Ws + bs
    slot_r = slot @ Ws + bs
    slot_rel = [slot @ Wr[i] + br[i] for i in range(4)]
    dia_rel = [dia @ Wr[i] + br[i] for i in range(4)]
    slot_r = slot_r + jnp.einsum('bsd,dh->bsh', m1, dia_rel[0]) / (m1.sum(-1, keepdims=True) + EPS)
    dia_r = dia_r + (jnp.einsum('bsd,bsh->bdh', m1, slot_rel[0])
                     / (m1.sum(1)[:, :, None] + EPS)).sum(0)
    slot_r = slot_r + jnp.einsum('bst,bth->bsh', m2, slot_rel[1]) / (m2.sum(-1, keepdims=True) + EPS)
    slot_r = slot_r + jnp.einsum('bsd,dh->bsh', m3, dia_rel[2]) / (m3.sum(-1, keepdims=True) + EPS)
    dia_r = dia_r + (jnp.einsum('bsd,bsh->bdh', m3, slot_rel[2])
                     / (m3.sum(1)[:, :, None] + EPS)).sum(0)
    slot_r = slot_r + jnp.einsum('bst,bth->bsh', m4, slot_rel[3]) / (m4.sum(-1, keepdims=True) + EPS)
    slot_gate = slot_r @ Wg1 + slot @ Wg2 + bg
    dia_gate = dia_r @ Wg1 + dia @ Wg2 + bg
    new_slot = jnp.maximum(slot_r, 0.0) * slot_gate + slot * (1.0 - slot_gate)
    new_dia = jnp.maximum(dia_r, 0.0) * dia_gate + dia * (1.0 - dia_gate)
    return new_slot, new_dia


if __name__ == "__main__":
    B, S, D, H = 2, 8, 8, 32
    layer_nums, relation_type = 2, 4

    key = jax.random.PRNGKey(0)
    ks = jax.random.split(key, 12)

    bnd_h = 1.0 / np.sqrt(H)
    bnd_2h = 1.0 / np.sqrt(2 * H)
    # f_s
    Ws = jax.random.uniform(ks[0], (H, H), jnp.float32, -bnd_h, bnd_h)
    bs = jax.random.uniform(ks[1], (1, H), jnp.float32, -bnd_h, bnd_h)
    # 4 relation linears
    Wr = jax.random.uniform(ks[2], (relation_type, H, H), jnp.float32, -bnd_h, bnd_h)
    br = jax.random.uniform(ks[3], (relation_type, H), jnp.float32, -bnd_h, bnd_h)
    # f_g (2H -> H), stored pre-transposed and split along the input dim
    Wg = jax.random.uniform(ks[4], (2 * H, H), jnp.float32, -bnd_2h, bnd_2h)
    bg = jax.random.uniform(ks[5], (1, H), jnp.float32, -bnd_2h, bnd_2h)
    Wg1, Wg2 = Wg[:H], Wg[H:]
    params = (Ws, bs, Wr, br, Wg1, Wg2, bg)

    slot_node = jax.random.normal(ks[6], (B, S, H), jnp.float32)
    dialogue_node = jax.random.normal(ks[7], (D, H), jnp.float32)
    m1 = jax.random.bernoulli(ks[8], 0.5, (B, S, D)).astype(jnp.float32)
    m2 = jax.random.bernoulli(ks[9], 0.5, (B, S, S)).astype(jnp.float32)
    m3 = jax.random.bernoulli(ks[10], 0.5, (B, S, D)).astype(jnp.float32)
    m4 = jax.random.bernoulli(ks[11], 0.5, (B, S, S)).astype(jnp.float32)

    fwd = jax.jit(functools.partial(multi_relational_gcn, layer_nums=layer_nums))
    slot_out, dia_out = fwd(slot_node, dialogue_node, m1, m2, m3, m4, params)
    jax.block_until_ready((slot_out, dia_out))

    # pure-JAX reference check (mirrors the PyTorch forward)
    rs, rd = slot_node, dialogue_node
    for _ in range(layer_nums):
        rs, rd = reference_layer(rs, rd, m1, m2, m3, m4, params)
    np.testing.assert_allclose(np.asarray(slot_out), np.asarray(rs), rtol=2e-2, atol=2e-2)
    np.testing.assert_allclose(np.asarray(dia_out), np.asarray(rd), rtol=2e-2, atol=2e-2)

    print("KERNEL_OK")
</pallas_src>

<mosaic_0001>
module attributes {stable_mosaic.version = 11 : i64} {
  func.func @gcn_kernel(%arg0: memref<24x32xf32, #tpu.memory_space<vmem>>, %arg1: memref<24x96xf32, #tpu.memory_space<vmem>>, %arg2: memref<32x192xf32, #tpu.memory_space<vmem>>, %arg3: memref<1x192xf32, #tpu.memory_space<vmem>>, %arg4: memref<32x32xf32, #tpu.memory_space<vmem>>, %arg5: memref<24x32xf32, #tpu.memory_space<vmem>>) attributes {dimension_semantics = [], scalar_prefetch = 0 : i64, scratch_operands = 0 : i64, tpu.core_type = #tpu.core_type<tc>} {
    %c0 = arith.constant 0 : index
    %c0_0 = arith.constant 0 : index
    %0 = vector.load %arg0[%c0, %c0_0] : memref<24x32xf32, #tpu.memory_space<vmem>>, vector<24x32xf32>
    %c0_1 = arith.constant 0 : index
    %c0_2 = arith.constant 0 : index
    %1 = vector.load %arg1[%c0_1, %c0_2] : memref<24x96xf32, #tpu.memory_space<vmem>>, vector<24x96xf32>
    %c0_3 = arith.constant 0 : index
    %c0_4 = arith.constant 0 : index
    %2 = vector.load %arg2[%c0_3, %c0_4] : memref<32x192xf32, #tpu.memory_space<vmem>>, vector<32x192xf32>
    %c0_5 = arith.constant 0 : index
    %c0_6 = arith.constant 0 : index
    %3 = vector.load %arg3[%c0_5, %c0_6] : memref<1x192xf32, #tpu.memory_space<vmem>>, vector<1x192xf32>
    %c0_7 = arith.constant 0 : index
    %c0_8 = arith.constant 0 : index
    %4 = vector.load %arg4[%c0_7, %c0_8] : memref<32x32xf32, #tpu.memory_space<vmem>>, vector<32x32xf32>
    %cst = arith.constant dense<0.000000e+00> : vector<24x192xf32>
    %5 = tpu.matmul %0, %2, %cst {dimension_numbers = #tpu.dot_dimension_numbers<[1], [0], [0], [1], [0, 0, 1, 1], [], []>} : vector<24x32xf32>, vector<32x192xf32>, vector<24x192xf32> -> vector<24x192xf32>
    %6 = vector.broadcast %3 : vector<1x192xf32> to vector<24x192xf32>
    %7 = arith.addf %5, %6 : vector<24x192xf32>
    %8 = vector.extract_strided_slice %7 {offsets = [0, 0], sizes = [24, 32], strides = [1, 1]} : vector<24x192xf32> to vector<24x32xf32>
    %9 = vector.extract_strided_slice %7 {offsets = [0, 32], sizes = [24, 32], strides = [1, 1]} : vector<24x192xf32> to vector<24x32xf32>
    %10 = vector.extract_strided_slice %7 {offsets = [0, 64], sizes = [24, 32], strides = [1, 1]} : vector<24x192xf32> to vector<24x32xf32>
    %11 = vector.extract_strided_slice %7 {offsets = [0, 96], sizes = [24, 32], strides = [1, 1]} : vector<24x192xf32> to vector<24x32xf32>
    %12 = vector.extract_strided_slice %7 {offsets = [0, 128], sizes = [24, 32], strides = [1, 1]} : vector<24x192xf32> to vector<24x32xf32>
    %13 = vector.extract_strided_slice %7 {offsets = [0, 160], sizes = [24, 32], strides = [1, 1]} : vector<24x192xf32> to vector<24x32xf32>
    %14 = tpu.concatenate %10, %11, %12, %13 in 0 : vector<24x32xf32>, vector<24x32xf32>, vector<24x32xf32>, vector<24x32xf32> -> vector<96x32xf32>
    %cst_9 = arith.constant dense<0.000000e+00> : vector<24x32xf32>
    %15 = tpu.matmul %1, %14, %cst_9 {dimension_numbers = #tpu.dot_dimension_numbers<[1], [0], [0], [1], [0, 0, 1, 1], [], []>} : vector<24x96xf32>, vector<96x32xf32>, vector<24x32xf32> -> vector<24x32xf32>
    %16 = arith.addf %8, %15 : vector<24x32xf32>
    %cst_10 = arith.constant dense<0.000000e+00> : vector<24x32xf32>
    %17 = tpu.matmul %16, %4, %cst_10 {dimension_numbers = #tpu.dot_dimension_numbers<[1], [0], [0], [1], [0, 0, 1, 1], [], []>} : vector<24x32xf32>, vector<32x32xf32>, vector<24x32xf32> -> vector<24x32xf32>
    %18 = arith.addf %17, %9 : vector<24x32xf32>
    %cst_11 = arith.constant 0.000000e+00 : f32
    %19 = vector.broadcast %cst_11 : f32 to vector<24x32xf32>
    %20 = arith.maximumf %16, %19 : vector<24x32xf32>
    %21 = arith.mulf %20, %18 : vector<24x32xf32>
    %cst_12 = arith.constant 1.000000e+00 : f32
    %22 = vector.broadcast %cst_12 : f32 to vector<24x32xf32>
    %23 = arith.subf %22, %18 : vector<24x32xf32>
    %24 = arith.mulf %0, %23 : vector<24x32xf32>
    %25 = arith.addf %21, %24 : vector<24x32xf32>
    %cst_13 = arith.constant dense<0.000000e+00> : vector<24x192xf32>
    %26 = tpu.matmul %25, %2, %cst_13 {dimension_numbers = #tpu.dot_dimension_numbers<[1], [0], [0], [1], [0, 0, 1, 1], [], []>} : vector<24x32xf32>, vector<32x192xf32>, vector<24x192xf32> -> vector<24x192xf32>
    %27 = vector.broadcast %3 : vector<1x192xf32> to vector<24x192xf32>
    %28 = arith.addf %26, %27 : vector<24x192xf32>
    %29 = vector.extract_strided_slice %28 {offsets = [0, 0], sizes = [24, 32], strides = [1, 1]} : vector<24x192xf32> to vector<24x32xf32>
    %30 = vector.extract_strided_slice %28 {offsets = [0, 32], sizes = [24, 32], strides = [1, 1]} : vector<24x192xf32> to vector<24x32xf32>
    %31 = vector.extract_strided_slice %28 {offsets = [0, 64], sizes = [24, 32], strides = [1, 1]} : vector<24x192xf32> to vector<24x32xf32>
    %32 = vector.extract_strided_slice %28 {offsets = [0, 96], sizes = [24, 32], strides = [1, 1]} : vector<24x192xf32> to vector<24x32xf32>
    %33 = vector.extract_strided_slice %28 {offsets = [0, 128], sizes = [24, 32], strides = [1, 1]} : vector<24x192xf32> to vector<24x32xf32>
    %34 = vector.extract_strided_slice %28 {offsets = [0, 160], sizes = [24, 32], strides = [1, 1]} : vector<24x192xf32> to vector<24x32xf32>
    %35 = tpu.concatenate %31, %32, %33, %34 in 0 : vector<24x32xf32>, vector<24x32xf32>, vector<24x32xf32>, vector<24x32xf32> -> vector<96x32xf32>
    %cst_14 = arith.constant dense<0.000000e+00> : vector<24x32xf32>
    %36 = tpu.matmul %1, %35, %cst_14 {dimension_numbers = #tpu.dot_dimension_numbers<[1], [0], [0], [1], [0, 0, 1, 1], [], []>} : vector<24x96xf32>, vector<96x32xf32>, vector<24x32xf32> -> vector<24x32xf32>
    %37 = arith.addf %29, %36 : vector<24x32xf32>
    %cst_15 = arith.constant dense<0.000000e+00> : vector<24x32xf32>
    %38 = tpu.matmul %37, %4, %cst_15 {dimension_numbers = #tpu.dot_dimension_numbers<[1], [0], [0], [1], [0, 0, 1, 1], [], []>} : vector<24x32xf32>, vector<32x32xf32>, vector<24x32xf32> -> vector<24x32xf32>
    %39 = arith.addf %38, %30 : vector<24x32xf32>
    %cst_16 = arith.constant 0.000000e+00 : f32
    %40 = vector.broadcast %cst_16 : f32 to vector<24x32xf32>
    %41 = arith.maximumf %37, %40 : vector<24x32xf32>
    %42 = arith.mulf %41, %39 : vector<24x32xf32>
    %cst_17 = arith.constant 1.000000e+00 : f32
    %43 = vector.broadcast %cst_17 : f32 to vector<24x32xf32>
    %44 = arith.subf %43, %39 : vector<24x32xf32>
    %45 = arith.mulf %25, %44 : vector<24x32xf32>
    %46 = arith.addf %42, %45 : vector<24x32xf32>
    %c0_18 = arith.constant 0 : index
    %c0_19 = arith.constant 0 : index
    %47 = vector.load %arg5[%c0_18, %c0_19] : memref<24x32xf32, #tpu.memory_space<vmem>>, vector<24x32xf32>
    tpu.vector_store %arg5[%c0_18, %c0_19], %46 {strides = array<i32>} : memref<24x32xf32, #tpu.memory_space<vmem>>, vector<24x32xf32>,
    return
  }
}

</mosaic_0001>

<bundles_post_ra>
// kernel: multi_relational_gcn.1
= control target key start
LH: loop header
LB: loop body
LE: loop exit
PB: predicated region body
PF: predicated region fallthrough
CT: control target
= control target key end

     0   :  { %vm44_vm0 = vcmask 261120   ;;  %s588_s16 = smov 32   ;;  %vm166_vm1 = vcmask 785408   ;;  %s853_s2 = inlined_call_operand.vmem [shape: f32[32,192], index: 2, kind: input, shape index: {}]   ;;  %s854_s0 = inlined_call_operand.vmem [shape: f32[24,32], index: 0, kind: input, shape index: {}]   ;;  %s855_s3 = inlined_call_operand.vmem [shape: f32[1,192], index: 3, kind: input, shape index: {}]   ;;  %s856_s4 = inlined_call_operand.vmem [shape: f32[32,32], index: 4, kind: input, shape index: {}]   ;;  %s857_s1 = inlined_call_operand.vmem [shape: f32[24,96], index: 1, kind: input, shape index: {}]   ;;  %s858_s5 = inlined_call_operand.vmem [shape: f32[24,32], index: 5, kind: output, shape index: {}]  }
   0x1   :  { %v33_v0 = vld [vmem:[%s853_s2 + $0x38] sm:$0xff]  ;;  %v31_v1 = vld [vmem:[%s853_s2 + $0x28] sm:$0xff]  ;;  %v632_v3 = vld [vmem:[%s853_s2 + $0x30] sm:$0xff] }
   0x2   :  { %92 = vmatpush.msra.mxu1 %v33_v0  ;;  %v29_v2 = vld [vmem:[%s853_s2 + $0x18] sm:$0xff]  ;;  %v637_v4 = vld [vmem:[%s853_s2 + $0x20] sm:$0xff]  ;;  %66 = vmatpush.msra.mxu0 %v632_v3  ;;  %v27_v5 = vld [vmem:[%s853_s2 + $0x8] sm:$0xff] }
   0x3   :  { %v646_v6 = vld [vmem:[%s853_s2 + $0x10] sm:$0xff]  ;;  %v651_v7 = vld [vmem:[%s854_s0] sm:$0xff]  ;;  %v668_v9 = vld [vmem:[%s854_s0 + $0x8] sm:$0xff] }
   0x4   :  { %93 = vmatpush.msra.mxu1 %v31_v1  ;;  %67 = vmatpush.msra.mxu0 %v637_v4  ;;  %v657_v8 = vld [vmem:[%s853_s2] sm:$0xff]  ;;  %v677_v10 = vld [vmem:[%s854_s0 + $0x10] sm:$0xff]  ;;  %s587_s0 = smov 64   ;;  %v38_v44 = vld [vmem:[%s856_s4 + $0x18] sm:$0xff] }
   0x5   :  { %v34_v15 = vld [vmem:[%s855_s3] sm:$0x3]  ;;  %s589_s3 = smov 96   ;;  %v37_v46 = vld [vmem:[%s856_s4 + $0x10] sm:$0xff]  ;;  %229 = vmatpush.msra.mxu3 %v38_v44  ;;  %v744_v62 = vld [vmem:[%s857_s1 + $0x8] sm:$0xff] }
   0x6   :  { %94 = vmatpush.msra.mxu1 %v29_v2  ;;  %68 = vmatpush.msra.mxu0 %v646_v6  ;;  %v686_v16 = vperm.slane %v34_v15, 1  ;;  %v688_v17 = vperm.slane %v34_v15, 0  ;;  %v739_v61 = vld [vmem:[%s857_s1] sm:$0xff]  ;;  %v755_v63 = vld [vmem:[%s857_s1 + $0x10] sm:$0xff] }
   0x7   :  { %230 = vmatpush.msra.mxu3 %v37_v46 }
   0x8   :  { %95 = vmatpush.msra.mxu1 %v27_v5  ;;  %69 = vmatpush.msra.mxu0 %v657_v8 }
   0x9   :  { %471 = vmatmul.msk.f32.vlgmr.msra.gmra.mxu1 %vm44_vm0, %v651_v7  ;;  %468 = vmatmul.msk.f32.vlgmr.msra.gmra.mxu0 %vm44_vm0, %v651_v7 }
   0xa   :  { %305 = vmatpush.msrb.mxu1 %v33_v0  ;;  %v36_v0 = vld [vmem:[%s856_s4 + $0x8] sm:$0xff] }
   0xb   :  { %231 = vmatpush.msra.mxu3 %v36_v0 }
   0xc   :  { %306 = vmatpush.msrb.mxu1 %v31_v1  ;;  %v35_v1 = vld [vmem:[%s856_s4] sm:$0xff] }
   0xd   :  { %232 = vmatpush.msra.mxu3 %v35_v1 }
   0xe   :  { %307 = vmatpush.msrb.mxu1 %v29_v2 }
  0x10   :  { %308 = vmatpush.msrb.mxu1 %v27_v5 }
  0x11   :  { %472 = vmatmul.msk.f32.gmra.mxu1 %vm44_vm0, %v668_v9  ;;  %469 = vmatmul.msk.f32.gmra.mxu0 %vm44_vm0, %v668_v9 }
  0x19   :  { %473 = vmatmul.msk.f32.gmra.mxu1 %vm44_vm0, %v677_v10  ;;  %470 = vmatmul.msk.f32.gmra.mxu0 %vm44_vm0, %v677_v10 }
  0x86   :  { %v97_v11 = vpop.f32.mrf.mxu1  ;;  %v71_v12 = vpop.f32.mrf.mxu0 }
  0x87   :  { %v98_v24 = vadd.f32 %v97_v11, %v686_v16  ;;  %v708_v26 = vadd.f32 %v71_v12, %v688_v17 }
  0x8e   :  { %v100_v13 = vpop.f32.mrf.mxu1  ;;  %v74_v14 = vpop.f32.mrf.mxu0 }
  0x8f   :  { %v101_v19 = vadd.f32 %v100_v13, %v686_v16  ;;  %v701_v25 = vadd.f32 %v74_v14, %v688_v17 }
  0x91   :  { %v542_v40 = vpack.i.bf16 %v708_v26, %v701_v25 }
  0x96   :  { %v103_v18 = vpop.f32.mrf.mxu1  ;;  %v77_v21 = vpop.f32.mrf.mxu0 }
  0x97   :  { %v104_v20 = vadd.f32 %v103_v18, %v686_v16  ;;  %v693_v23 = vadd.f32 %v77_v21, %v688_v17 }
  0x99   :  { %v512_v22 = vpack.i.bf16 %v101_v19, %v104_v20  ;;  %113 = vrot.lane.b32.xlu2 %v693_v23, %s589_s3 }
  0x9b   :  { %513 = vrot.lane.b32.xlu1 %v512_v22, %s587_s0  ;;  %508 = vrot.lane.b32.xlu0 %v512_v22, %s588_s16 }
  0xa1   :  { %111 = vrot.lane.b32.xlu2 %v701_v25, %s589_s3 }
  0xa3   :  { %118 = vrot.lane.b32.xlu1 %v98_v24, %s587_s0  ;;  %124 = vrot.lane.b32.xlu0 %v98_v24, %s588_s16 }
  0xab   :  { %109 = vrot.lane.b32.xlu0 %v708_v26, %s589_s3 }
  0xf3   :  { %v712_v27 = vpop.permute.xlu2 %113 }
  0xfb   :  { %v715_v30 = vpop.permute.xlu2 %111 }
  0xfc   :  { %v532_v37 = vpack.i.bf16 %v715_v30, %v712_v27 }
 0x10d   :  { %v514_v28 = vpop.permute.xlu1 %513  ;;  %v509_v29 = vpop.permute.xlu0 %508 }
 0x10e   :  { %518 = vrot.lane.b32.xlu1 %v509_v29, %s587_s0  ;;  %v516_v31 = vunpack.i.h.bf16 %v514_v28  ;;  %v515_v32 = vunpack.i.l.bf16 %v514_v28 }
 0x115   :  { %v119_v33 = vpop.permute.xlu1 %118  ;;  %v125_v34 = vpop.permute.xlu0 %124 }
 0x116   :  { %v527_v35 = vpack.i.bf16 %v119_v33, %v516_v31  ;;  %v522_v36 = vpack.i.bf16 %v515_v32, %v125_v34  ;;  %533 = vrot.lane.b32.xlu1 %v532_v37, %s587_s0 }
 0x118   :  { %523 = vrot.lane.b32.xlu2 %v522_v36, %s587_s0  ;;  %528 = vrot.lane.b32.xlu0 %v527_v35, %s587_s0 }
 0x11d   :  { %v722_v38 = vpop.permute.xlu0 %109 }
 0x11e   :  { %v537_v39 = vpack.i.bf16 %v693_v23, %v722_v38 }
 0x120   :  { %543 = vrot.lane.b32.xlu0 %v542_v40, %s587_s0  ;;  %538 = vrot.lane.b32.xlu2 %v537_v39, %s587_s0 }
 0x172   :  { %v524_v43 = vpop.permute.xlu2 %523 }
 0x173   :  { %v525_v47 = vunpack.i.l.bf16 %v524_v43  ;;  %v526_v49 = vunpack.i.h.bf16 %v524_v43 }
 0x17a   :  { %v539_v54 = vpop.permute.xlu2 %538 }
 0x17b   :  { %v540_v56 = vunpack.i.l.bf16 %v539_v54  ;;  %v541_v58 = vunpack.i.h.bf16 %v539_v54 }
 0x180   :  { %v519_v41 = vpop.permute.xlu1 %518 }
 0x181   :  { %v520_v42 = vunpack.i.l.bf16 %v519_v41  ;;  %v521_v45 = vunpack.i.h.bf16 %v519_v41 }
 0x183   :  { %180 = vmatpush.msrb.mxu0 %v520_v42  ;;  %492 = vmatpush.msra.mxu2 %v520_v42 }
 0x185   :  { %181 = vmatpush.msrb.mxu0 %v521_v45  ;;  %493 = vmatpush.msra.mxu2 %v521_v45 }
 0x187   :  { %182 = vmatpush.msrb.mxu0 %v525_v47  ;;  %494 = vmatpush.msra.mxu2 %v525_v47 }
 0x188   :  { %v534_v51 = vpop.permute.xlu1 %533 }
 0x189   :  { %183 = vmatpush.msrb.mxu0 %v526_v49  ;;  %495 = vmatpush.msra.mxu2 %v526_v49  ;;  %v535_v53 = vunpack.i.l.bf16 %v534_v51  ;;  %v536_v55 = vunpack.i.h.bf16 %v534_v51 }
 0x18a   :  { %v529_v48 = vpop.permute.xlu0 %528 }
 0x18b   :  { %v530_v50 = vunpack.i.l.bf16 %v529_v48  ;;  %v531_v52 = vunpack.i.h.bf16 %v529_v48 }
 0x18d   :  { %184 = vmatpush.msrb.mxu0 %v530_v50  ;;  %496 = vmatpush.msra.mxu2 %v530_v50 }
 0x18f   :  { %185 = vmatpush.msrb.mxu0 %v531_v52  ;;  %497 = vmatpush.msra.mxu2 %v531_v52 }
 0x191   :  { %186 = vmatpush.msrb.mxu0 %v535_v53  ;;  %498 = vmatpush.msra.mxu2 %v535_v53 }
 0x192   :  { %v544_v57 = vpop.permute.xlu0 %543 }
 0x193   :  { %187 = vmatpush.msrb.mxu0 %v536_v55  ;;  %499 = vmatpush.msra.mxu2 %v536_v55  ;;  %v545_v59 = vunpack.i.l.bf16 %v544_v57  ;;  %v546_v60 = vunpack.i.h.bf16 %v544_v57 }
 0x195   :  { %188 = vmatpush.msrb.mxu0 %v540_v56  ;;  %500 = vmatpush.msra.mxu2 %v540_v56 }
 0x197   :  { %189 = vmatpush.msrb.mxu0 %v541_v58  ;;  %501 = vmatpush.msra.mxu2 %v541_v58 }
 0x199   :  { %190 = vmatpush.msrb.mxu0 %v545_v59  ;;  %502 = vmatpush.msra.mxu2 %v545_v59 }
 0x19b   :  { %191 = vmatpush.msrb.mxu0 %v546_v60  ;;  %503 = vmatpush.msra.mxu2 %v546_v60 }
 0x19c   :  { %474 = vmatmul.msk.f32.vlgmr.msrb.gmra.mxu0 %vm166_vm1, %v739_v61  ;;  %475 = vmatmul.msk.f32.vlgmr.msra.gmra.mxu2 %vm166_vm1, %v744_v62 }
 0x19d   :  { %279 = vmatpush.msra.mxu0 %v632_v3  ;;  %432 = vmatpush.msrb.mxu2 %v38_v44 }
 0x19f   :  { %280 = vmatpush.msra.mxu0 %v637_v4  ;;  %433 = vmatpush.msrb.mxu2 %v37_v46 }
 0x1a1   :  { %281 = vmatpush.msra.mxu0 %v646_v6  ;;  %434 = vmatpush.msrb.mxu2 %v36_v0 }
 0x1a3   :  { %282 = vmatpush.msra.mxu0 %v657_v8  ;;  %435 = vmatpush.msrb.mxu2 %v35_v1 }
 0x1a4   :  { %476 = vmatmul.msk.f32.gmra.mxu2 %vm166_vm1, %v755_v63 }
 0x219   :  { %v193_v2 = vpop.f32.mrf.mxu0 }
 0x21a   :  { %v202_v3 = vadd.f32 %v193_v2, %v708_v26 }
 0x21c   :  { %477 = vmatmul.msk.f32.vlgmr.msra.gmra.mxu3 %vm44_vm0, %v202_v3  ;;  %v243_v13 = vmax.f32 %v202_v3, 0.0 }
 0x21f   :  { %v196_v4 = vpop.f32.mrf.mxu2 }
 0x220   :  { %v203_v5 = vadd.f32 %v196_v4, %v701_v25 }
 0x222   :  { %v244_v22 = vmax.f32 %v203_v5, 0.0 }
 0x224   :  { %478 = vmatmul.msk.f32.gmra.mxu3 %vm44_vm0, %v203_v5 }
 0x227   :  { %v199_v6 = vpop.f32.mrf.mxu2 }
 0x228   :  { %v204_v8 = vadd.f32 %v199_v6, %v693_v23 }
 0x22a   :  { %v245_v29 = vmax.f32 %v204_v8, 0.0 }
 0x22c   :  { %479 = vmatmul.msk.f32.gmra.mxu3 %vm44_vm0, %v204_v8 }
 0x29f   :  { %v234_v11 = vpop.f32.mrf.mxu3 }
 0x2a0   :  { %v235_v12 = vadd.f32 %v234_v11, %v722_v38 }
 0x2a2   :  { %v249_v14 = vsub.f32 1.0, %v235_v12  ;;  %v246_v15 = vmul.f32 %v243_v13, %v235_v12 }
 0x2a4   :  { %v252_v18 = vmul.f32 %v249_v14, %v651_v7 }
 0x2a6   :  { %v775_v19 = vadd.f32 %v252_v18, %v246_v15 }
 0x2a7   :  { %v237_v20 = vpop.f32.mrf.mxu3 }
 0x2a8   :  { %v238_v21 = vadd.f32 %v237_v20, %v715_v30  ;;  %480 = vmatmul.msk.f32.vlgmr.msra.gmra.mxu0 %vm44_vm0, %v775_v19  ;;  %483 = vmatmul.msk.f32.vlgmr.msrb.gmra.mxu1 %vm44_vm0, %v775_v19 }
 0x2aa   :  { %v250_v23 = vsub.f32 1.0, %v238_v21  ;;  %v247_v24 = vmul.f32 %v244_v22, %v238_v21 }
 0x2ac   :  { %v253_v25 = vmul.f32 %v250_v23, %v668_v9 }
 0x2ae   :  { %v783_v26 = vadd.f32 %v253_v25, %v247_v24 }
 0x2af   :  { %v240_v28 = vpop.f32.mrf.mxu3 }
 0x2b0   :  { %v241_v7 = vadd.f32 %v240_v28, %v712_v27  ;;  %481 = vmatmul.msk.f32.gmra.mxu0 %vm44_vm0, %v783_v26  ;;  %484 = vmatmul.msk.f32.gmra.mxu1 %vm44_vm0, %v783_v26 }
 0x2b2   :  { %v251_v30 = vsub.f32 1.0, %v241_v7  ;;  %v248_v31 = vmul.f32 %v245_v29, %v241_v7 }
 0x2b4   :  { %v254_v32 = vmul.f32 %v251_v30, %v677_v10 }
 0x2b6   :  { %v791_v33 = vadd.f32 %v254_v32, %v248_v31 }
 0x2b8   :  { %482 = vmatmul.msk.f32.gmra.mxu0 %vm44_vm0, %v791_v33  ;;  %485 = vmatmul.msk.f32.gmra.mxu1 %vm44_vm0, %v791_v33 }
 0x325   :  { %v284_v9 = vpop.f32.mrf.mxu0  ;;  %v310_v27 = vpop.f32.mrf.mxu1 }
 0x326   :  { %v311_v34 = vadd.f32 %v310_v27, %v686_v16  ;;  %v285_v43 = vadd.f32 %v284_v9, %v688_v17 }
 0x328   :  { %337 = vrot.lane.b32.xlu2 %v311_v34, %s588_s16 }
 0x32d   :  { %v287_v35 = vpop.f32.mrf.mxu0  ;;  %v313_v36 = vpop.f32.mrf.mxu1 }
 0x32e   :  { %v314_v10 = vadd.f32 %v313_v36, %v686_v16  ;;  %v288_v42 = vadd.f32 %v287_v35, %v688_v17 }
 0x330   :  { %v582_v55 = vpack.i.bf16 %v285_v43, %v288_v42 }
 0x335   :  { %v290_v37 = vpop.f32.mrf.mxu0  ;;  %v316_v38 = vpop.f32.mrf.mxu1 }
 0x336   :  { %v801_v39 = vadd.f32 %v290_v37, %v688_v17  ;;  %v317_v40 = vadd.f32 %v316_v38, %v686_v16 }
 0x338   :  { %v552_v41 = vpack.i.bf16 %v314_v10, %v317_v40  ;;  %326 = vrot.lane.b32.xlu2 %v801_v39, %s589_s3 }
 0x33a   :  { %553 = vrot.lane.b32.xlu0 %v552_v41, %s587_s0  ;;  %548 = vrot.lane.b32.xlu1 %v552_v41, %s588_s16 }
 0x342   :  { %331 = vrot.lane.b32.xlu1 %v311_v34, %s587_s0  ;;  %324 = vrot.lane.b32.xlu0 %v288_v42, %s589_s3 }
 0x34a   :  { %322 = vrot.lane.b32.xlu1 %v285_v43, %s589_s3 }
 0x382   :  { %v338_v46 = vpop.permute.xlu2 %337 }
 0x392   :  { %v817_v52 = vpop.permute.xlu2 %326 }
 0x3ac   :  { %v554_v44 = vpop.permute.xlu0 %553  ;;  %v549_v16 = vpop.permute.xlu1 %548 }
 0x3ad   :  { %v555_v45 = vunpack.i.l.bf16 %v554_v44  ;;  %558 = vrot.lane.b32.xlu2 %v549_v16, %s587_s0  ;;  %v556_v48 = vunpack.i.h.bf16 %v554_v44 }
 0x3af   :  { %v562_v47 = vpack.i.bf16 %v555_v45, %v338_v46 }
 0x3b1   :  { %563 = vrot.lane.b32.xlu0 %v562_v47, %s587_s0 }
 0x3b4   :  { %v332_v49 = vpop.permute.xlu1 %331  ;;  %v815_v50 = vpop.permute.xlu0 %324 }
 0x3b5   :  { %v567_v51 = vpack.i.bf16 %v332_v49, %v556_v48  ;;  %v572_v17 = vpack.i.bf16 %v815_v50, %v817_v52 }
 0x3b7   :  { %568 = vrot.lane.b32.xlu1 %v567_v51, %s587_s0  ;;  %573 = vrot.lane.b32.xlu2 %v572_v17, %s587_s0 }
 0x3bc   :  { %v323_v53 = vpop.permute.xlu1 %322 }
 0x3bd   :  { %v577_v54 = vpack.i.bf16 %v801_v39, %v323_v53 }
 0x3bf   :  { %583 = vrot.lane.b32.xlu1 %v582_v55, %s587_s0  ;;  %578 = vrot.lane.b32.xlu0 %v577_v54, %s587_s0 }
 0x407   :  { %v559_v56 = vpop.permute.xlu2 %558 }
 0x408   :  { %v560_v57 = vunpack.i.l.bf16 %v559_v56  ;;  %v561_v58 = vunpack.i.h.bf16 %v559_v56 }
 0x40a   :  { %383 = vmatpush.msrb.mxu3 %v560_v57 }
 0x40c   :  { %384 = vmatpush.msrb.mxu3 %v561_v58 }
 0x411   :  { %v574_v3 = vpop.permute.xlu2 %573 }
 0x412   :  { %v575_v5 = vunpack.i.l.bf16 %v574_v3  ;;  %v576_v6 = vunpack.i.h.bf16 %v574_v3 }
 0x423   :  { %v564_v59 = vpop.permute.xlu0 %563 }
 0x424   :  { %v565_v60 = vunpack.i.l.bf16 %v564_v59  ;;  %v566_v0 = vunpack.i.h.bf16 %v564_v59 }
 0x426   :  { %385 = vmatpush.msrb.mxu3 %v565_v60 }
 0x428   :  { %386 = vmatpush.msrb.mxu3 %v566_v0 }
 0x429   :  { %v569_v1 = vpop.permute.xlu1 %568 }
 0x42a   :  { %v570_v2 = vunpack.i.l.bf16 %v569_v1  ;;  %v571_v4 = vunpack.i.h.bf16 %v569_v1 }
 0x42c   :  { %387 = vmatpush.msrb.mxu3 %v570_v2 }
 0x42e   :  { %388 = vmatpush.msrb.mxu3 %v571_v4 }
 0x430   :  { %389 = vmatpush.msrb.mxu3 %v575_v5 }
 0x431   :  { %v579_v8 = vpop.permute.xlu0 %578  ;;  %v584_v12 = vpop.permute.xlu1 %583 }
 0x432   :  { %v580_v11 = vunpack.i.l.bf16 %v579_v8  ;;  %390 = vmatpush.msrb.mxu3 %v576_v6  ;;  %v581_v13 = vunpack.i.h.bf16 %v579_v8  ;;  %v585_v14 = vunpack.i.l.bf16 %v584_v12  ;;  %v586_v15 = vunpack.i.h.bf16 %v584_v12 }
 0x434   :  { %391 = vmatpush.msrb.mxu3 %v580_v11 }
 0x436   :  { %392 = vmatpush.msrb.mxu3 %v581_v13 }
 0x438   :  { %393 = vmatpush.msrb.mxu3 %v585_v14 }
 0x43a   :  { %394 = vmatpush.msrb.mxu3 %v586_v15 }
 0x43b   :  { %486 = vmatmul.msk.f32.vlgmr.msrb.gmra.mxu3 %vm166_vm1, %v739_v61 }
 0x443   :  { %487 = vmatmul.msk.f32.gmra.mxu3 %vm166_vm1, %v744_v62 }
 0x44b   :  { %488 = vmatmul.msk.f32.gmra.mxu3 %vm166_vm1, %v755_v63 }
 0x4be   :  { %v396_v18 = vpop.f32.mrf.mxu3 }
 0x4bf   :  { %v405_v20 = vadd.f32 %v396_v18, %v285_v43 }
 0x4c1   :  { %489 = vmatmul.msk.f32.vlgmr.msrb.gmra.mxu2 %vm44_vm0, %v405_v20  ;;  %v446_v28 = vmax.f32 %v405_v20, 0.0 }
 0x4c6   :  { %v399_v21 = vpop.f32.mrf.mxu3 }
 0x4c7   :  { %v406_v22 = vadd.f32 %v399_v21, %v288_v42 }
 0x4c9   :  { %490 = vmatmul.msk.f32.gmra.mxu2 %vm44_vm0, %v406_v22  ;;  %v447_v32 = vmax.f32 %v406_v22, 0.0 }
 0x4ce   :  { %v402_v23 = vpop.f32.mrf.mxu3 }
 0x4cf   :  { %v407_v24 = vadd.f32 %v402_v23, %v801_v39 }
 0x4d1   :  { %491 = vmatmul.msk.f32.gmra.mxu2 %vm44_vm0, %v407_v24  ;;  %v448_v37 = vmax.f32 %v407_v24, 0.0 }
 0x544   :  { %v437_v61 = vpop.f32.mrf.mxu2 }
 0x545   :  { %v438_v25 = vadd.f32 %v437_v61, %v323_v53 }
 0x547   :  { %v452_v62 = vsub.f32 1.0, %v438_v25  ;;  %v449_v7 = vmul.f32 %v446_v28, %v438_v25 }
 0x549   :  { %v455_v63 = vmul.f32 %v452_v62, %v775_v19 }
 0x54b   :  { %v458_v29 = vadd.f32 %v455_v63, %v449_v7 }
 0x54c   :  { %v440_v30 = vpop.f32.mrf.mxu2 }
 0x54d   :  { %461 = vst.msk [vmem:[%s858_s5] sm:$0xff] %vm44_vm0, %v458_v29  ;;  %v441_v31 = vadd.f32 %v440_v30, %v815_v50 }
 0x54f   :  { %v453_v9 = vsub.f32 1.0, %v441_v31  ;;  %v450_v27 = vmul.f32 %v447_v32, %v441_v31 }
 0x551   :  { %v456_v34 = vmul.f32 %v453_v9, %v783_v26 }
 0x553   :  { %v459_v35 = vadd.f32 %v456_v34, %v450_v27 }
 0x554   :  { %v443_v36 = vpop.f32.mrf.mxu2 }
 0x555   :  { %462 = vst.msk [vmem:[%s858_s5 + $0x8] sm:$0xff] %vm44_vm0, %v459_v35  ;;  %v444_v19 = vadd.f32 %v443_v36, %v817_v52 }
 0x557   :  { %v454_v38 = vsub.f32 1.0, %v444_v19  ;;  %v451_v10 = vmul.f32 %v448_v37, %v444_v19 }
 0x559   :  { %v457_v39 = vmul.f32 %v454_v38, %v791_v33 }
 0x55b   :  { %v460_v40 = vadd.f32 %v457_v39, %v451_v10 }
 0x55d   :  { %463 = vst.msk [vmem:[%s858_s5 + $0x10] sm:$0xff] %vm44_vm0, %v460_v40 }

</bundles_post_ra>
